<compile_context>
chip_gen: v6e
topology: v6e:2x2x1
jax: 0.10.0
libtpu: 0.0.40
codegen_flags: <defaults>
</compile_context>

<pallas_src>
import functools

import jax
import jax.numpy as jnp
from jax.experimental import pallas as pl
from jax.experimental.pallas import tpu as pltpu

IN_F = 28 * 28     # 784 logical input features (kept unpadded: x read once)
H1_F = 128
H2_F = 64
H2_P = 128         # padded hidden-2 width (lane-dense)
OUT_F = 10
OUT_P = 128        # padded logits width (lane-dense matmul/softmax/store)
NEG_BIG = -1e30    # bias for padded logit columns -> exp() underflows to 0


def _round_up(n, m):
    return (n + m - 1) // m * m


def _choose_tiling(batch, max_tb):
    """Pick (tile_rows, padded_batch).

    Preference order (all static Python, evaluated at trace time):
      * tile_rows divides the (8-rounded) batch exactly -> no batch padding,
        so x never gets an extra HBM copy            (review item #1),
      * >= 2 tiles once batch >= 256 so the 'parallel' axis can shard across
        v7x's two TensorCores                        (review item #3),
      * tiles as tall as possible (<= max_tb) to amortize the ~0.35 us
        per-grid-step overhead                       (review item #2).
    Falls back to minimal padding when the batch has no usable divisor.
    """
    b8 = _round_up(batch, 8)
    max_tb = max(8, (int(max_tb) // 8) * 8)
    if b8 >= 256:
        cap = min(max_tb, _round_up(-(-b8 // 2), 8))   # force >= 2 tiles
    else:
        cap = min(max_tb, b8)
    cap = max(cap, 8)

    # Largest multiple-of-8 divisor of b8 that is <= cap.
    tb_div = 8
    for cand in range(cap, 7, -8):
        if b8 % cand == 0:
            tb_div = cand
            break
    if tb_div >= min(128, cap):
        return tb_div, b8                      # exact fit, no batch padding

    # Fallback: near-cap tiles, minimal zero padding.
    num_tiles = -(-b8 // cap)
    tb = _round_up(-(-b8 // num_tiles), 8)
    return tb, tb * num_tiles


def mlp_kernel(x_ref, w1_ref, b1_ref, w2_ref, b2_ref, w3_ref, b3_ref, o_ref):
    """One batch tile of the full forward pass: 3 matmuls + ReLU + log_softmax."""
    # x arrives as raw f32 rows (tb, 784); cast to the MXU compute dtype here,
    # in VMEM, so HBM only ever sees one read of x.
    x = x_ref[...].astype(w1_ref.dtype)

    # fc1 + ReLU  (bf16 MXU matmul, f32 accumulation / elementwise)
    h1 = jnp.dot(x, w1_ref[...], preferred_element_type=jnp.float32)      # (tb,128)
    h1 = jnp.maximum(h1 + b1_ref[...], 0.0)

    # fc2 + ReLU  (64 padded to 128; padded cols are exactly 0 after ReLU)
    h2 = jnp.dot(h1.astype(w2_ref.dtype), w2_ref[...],
                 preferred_element_type=jnp.float32)                      # (tb,128)
    h2 = jnp.maximum(h2 + b2_ref[...], 0.0)

    # fc3  (10 padded to 128; padded cols get bias -1e30)
    logits = jnp.dot(h2.astype(w3_ref.dtype), w3_ref[...],
                     preferred_element_type=jnp.float32)                  # (tb,128)
    logits = logits + b3_ref[...]

    # Numerically stable log_softmax along the feature axis, in f32.
    m = jnp.max(logits, axis=1, keepdims=True)
    shifted = logits - m
    lse = jnp.log(jnp.sum(jnp.exp(shifted), axis=1, keepdims=True))
    o_ref[...] = (shifted - lse).astype(o_ref.dtype)


@functools.partial(jax.jit,
                   static_argnames=("max_tb", "compute_dtype", "out_dtype"))
def mlp_forward(x, params, max_tb=1024, compute_dtype=jnp.bfloat16,
                out_dtype=jnp.float32):
    """x: [B, 1, 28, 28] float32 (NCHW). Returns log-probs [B, 10] in out_dtype."""
    w1, b1, w2, b2, w3, b3 = params
    B = x.shape[0]

    tb, Bp = _choose_tiling(B, max_tb)
    num_tiles = Bp // tb

    # x: only reshape (free); pad batch rows only if the tiling demands it
    # (tiling is chosen so this is a no-op for typical batch sizes).
    x2 = x.reshape(B, IN_F)
    if Bp != B:
        x2 = jnp.pad(x2, ((0, Bp - B), (0, 0)))

    # Weight prep is tiny (<0.5 MB total) and stays fused inside this jit.
    w1c = w1.astype(compute_dtype)                                         # (784,128)
    b1c = b1.astype(jnp.float32)                                           # (1,128)
    w2p = jnp.pad(w2, ((0, 0), (0, H2_P - H2_F))).astype(compute_dtype)    # (128,128)
    b2p = jnp.pad(b2, ((0, 0), (0, H2_P - H2_F))).astype(jnp.float32)      # (1,128)
    w3p = jnp.pad(w3, ((0, H2_P - H2_F), (0, OUT_P - OUT_F))
                  ).astype(compute_dtype)                                  # (128,128)
    b3p = jnp.pad(b3, ((0, 0), (0, OUT_P - OUT_F)),
                  constant_values=NEG_BIG).astype(jnp.float32)             # (1,128)

    w_itemsize = jnp.dtype(compute_dtype).itemsize
    cost = pl.CostEstimate(
        flops=2 * Bp * (IN_F * H1_F + H1_F * H2_P + H2_P * OUT_P),
        transcendentals=Bp * (OUT_P + 1),                 # exp row-block + log
        bytes_accessed=(Bp * IN_F * x2.dtype.itemsize                      # x (once)
                        + (IN_F * H1_F + H1_F * H2_P + H2_P * OUT_P) * w_itemsize
                        + (H1_F + H2_P + OUT_P) * 4                        # biases
                        + Bp * OUT_P * jnp.dtype(out_dtype).itemsize),     # out
    )

    _const = lambda i: (0, 0)   # weights / biases: same (whole) block every step

    out = pl.pallas_call(
        mlp_kernel,
        out_shape=jax.ShapeDtypeStruct((Bp, OUT_P), out_dtype),
        grid_spec=pltpu.PrefetchScalarGridSpec(
            num_scalar_prefetch=0,
            grid=(num_tiles,),
            in_specs=[
                pl.BlockSpec((tb, IN_F), lambda i: (i, 0)),   # x tile, raw f32
                pl.BlockSpec((IN_F, H1_F), _const),           # W1 (784,128)
                pl.BlockSpec((1, H1_F), _const),              # b1
                pl.BlockSpec((H1_F, H2_P), _const),           # W2 (128,128)
                pl.BlockSpec((1, H2_P), _const),              # b2
                pl.BlockSpec((H2_P, OUT_P), _const),          # W3 (128,128)
                pl.BlockSpec((1, OUT_P), _const),             # b3
            ],
            out_specs=pl.BlockSpec((tb, OUT_P), lambda i: (i, 0)),
        ),
        compiler_params=pltpu.CompilerParams(
            dimension_semantics=("parallel",),   # batch tiles shard across TCs
            vmem_limit_bytes=32 * 1024 * 1024,   # tb=1024 footprint ~12 MB
        ),
        cost_estimate=cost,
    )(x2, w1c, b1c, w2p, b2p, w3p, b3p)

    # Slice off batch padding (if any) and the 118 padded logit columns.
    return out[:B, :OUT_F]


def init_params(key):
    """Deterministic init mimicking nn.Linear default (uniform +/- 1/sqrt(fan_in)).

    Weights are stored transposed vs. PyTorch: [in_features, out_features]."""
    def linear(key, fan_in, fan_out):
        kw, kb = jax.random.split(key)
        bound = 1.0 / jnp.sqrt(float(fan_in))
        w = jax.random.uniform(kw, (fan_in, fan_out), jnp.float32, -bound, bound)
        b = jax.random.uniform(kb, (1, fan_out), jnp.float32, -bound, bound)
        return w, b

    k1, k2, k3 = jax.random.split(key, 3)
    w1, b1 = linear(k1, IN_F, H1_F)
    w2, b2 = linear(k2, H1_F, H2_F)
    w3, b3 = linear(k3, H2_F, OUT_F)
    return (w1, b1, w2, b2, w3, b3)


def mlp_reference(x, params):
    """Pure-JAX f32 reference (highest matmul precision) for correctness checks."""
    w1, b1, w2, b2, w3, b3 = params
    hp = jax.lax.Precision.HIGHEST
    h = x.reshape(x.shape[0], IN_F)
    h = jax.nn.relu(jnp.dot(h, w1, precision=hp) + b1)
    h = jax.nn.relu(jnp.dot(h, w2, precision=hp) + b2)
    logits = jnp.dot(h, w3, precision=hp) + b3
    return jax.nn.log_softmax(logits, axis=1)


if __name__ == "__main__":
    key = jax.random.PRNGKey(0)
    kx, kp = jax.random.split(key)
    params = init_params(kp)

    # --- Small MNIST-shaped batch, f32 compute path: padding / tiling / the
    #     -1e30 logit-column trick must reproduce the reference.  Tolerance is
    #     loose-ish because MXU f32 pass decomposition / accumulation order
    #     differs from XLA's (flagged by the review). ---
    x_small = jax.random.normal(kx, (2, 1, 28, 28), jnp.float32)
    ref_small = mlp_reference(x_small, params)

    out_f32 = jax.block_until_ready(
        mlp_forward(x_small, params, compute_dtype=jnp.float32))
    assert out_f32.shape == (2, 10), out_f32.shape
    assert bool(jnp.all(jnp.isfinite(out_f32)))
    assert jnp.allclose(out_f32, ref_small, atol=1e-2, rtol=1e-2), "f32 mismatch"

    # --- Default path: bf16 streamed into the MXU, f32 accumulation/epilogue. ---
    out_bf16 = jax.block_until_ready(mlp_forward(x_small, params))
    assert out_bf16.shape == (2, 10), out_bf16.shape
    assert jnp.allclose(out_bf16, ref_small, atol=1e-1, rtol=1e-1), "bf16 mismatch"
    assert jnp.allclose(jnp.sum(jnp.exp(out_bf16), axis=1), 1.0, atol=1e-5)

    # --- Large batch: exercises the multi-tile 'parallel' grid with NO batch
    #     padding (B=1000 -> tb=200, grid=(5,)) and the bf16 output option. ---
    x_big = jax.random.normal(kx, (1000, 1, 28, 28), jnp.float32)
    out_big = jax.block_until_ready(
        mlp_forward(x_big, params, out_dtype=jnp.bfloat16))
    ref_big = mlp_reference(x_big, params)
    assert out_big.shape == (1000, 10), out_big.shape
    assert out_big.dtype == jnp.bfloat16
    assert jnp.allclose(out_big.astype(jnp.float32), ref_big,
                        atol=1.5e-1, rtol=1e-1), "big-batch mismatch"

    print("KERNEL_OK")
</pallas_src>

<mosaic_0001>
module attributes {stable_mosaic.version = 11 : i64} {
  func.func @mlp_kernel(%arg0: i32, %arg1: memref<8x784xf32, #tpu.memory_space<vmem>>, %arg2: memref<784x128xf32, #tpu.memory_space<vmem>>, %arg3: memref<1x128xf32, #tpu.memory_space<vmem>>, %arg4: memref<128x128xf32, #tpu.memory_space<vmem>>, %arg5: memref<1x128xf32, #tpu.memory_space<vmem>>, %arg6: memref<128x128xf32, #tpu.memory_space<vmem>>, %arg7: memref<1x128xf32, #tpu.memory_space<vmem>>, %arg8: memref<8x128xf32, #tpu.memory_space<vmem>>) attributes {dimension_semantics = [#tpu.dimension_semantics<parallel>], iteration_bounds = array<i64: 1>, scalar_prefetch = 0 : i64, scratch_operands = 0 : i64, tpu.core_type = #tpu.core_type<tc>, window_params = [{transform_indices = @transform_0, window_bounds = array<i64: 8, 784>}, {pipeline_mode = #tpu.pipeline_mode<synchronous>, transform_indices = @transform_1, window_bounds = array<i64: 784, 128>}, {pipeline_mode = #tpu.pipeline_mode<synchronous>, transform_indices = @transform_2, window_bounds = array<i64: 1, 128>}, {pipeline_mode = #tpu.pipeline_mode<synchronous>, transform_indices = @transform_3, window_bounds = array<i64: 128, 128>}, {pipeline_mode = #tpu.pipeline_mode<synchronous>, transform_indices = @transform_4, window_bounds = array<i64: 1, 128>}, {pipeline_mode = #tpu.pipeline_mode<synchronous>, transform_indices = @transform_5, window_bounds = array<i64: 128, 128>}, {pipeline_mode = #tpu.pipeline_mode<synchronous>, transform_indices = @transform_6, window_bounds = array<i64: 1, 128>}, {transform_indices = @transform_7, window_bounds = array<i64: 8, 128>}]} {
    %c0 = arith.constant 0 : index
    %c0_0 = arith.constant 0 : index
    %0 = vector.load %arg1[%c0, %c0_0] : memref<8x784xf32, #tpu.memory_space<vmem>>, vector<8x784xf32>
    %c0_1 = arith.constant 0 : index
    %c0_2 = arith.constant 0 : index
    %1 = vector.load %arg2[%c0_1, %c0_2] : memref<784x128xf32, #tpu.memory_space<vmem>>, vector<784x128xf32>
    %cst = arith.constant dense<0.000000e+00> : vector<8x128xf32>
    %2 = tpu.matmul %0, %1, %cst {dimension_numbers = #tpu.dot_dimension_numbers<[1], [0], [0], [1], [0, 0, 1, 1], [], []>} : vector<8x784xf32>, vector<784x128xf32>, vector<8x128xf32> -> vector<8x128xf32>
    %c0_3 = arith.constant 0 : index
    %c0_4 = arith.constant 0 : index
    %3 = vector.load %arg3[%c0_3, %c0_4] : memref<1x128xf32, #tpu.memory_space<vmem>>, vector<1x128xf32>
    %4 = vector.broadcast %3 : vector<1x128xf32> to vector<8x128xf32>
    %5 = arith.addf %2, %4 : vector<8x128xf32>
    %cst_5 = arith.constant 0.000000e+00 : f32
    %6 = vector.broadcast %cst_5 : f32 to vector<8x128xf32>
    %7 = arith.maximumf %5, %6 : vector<8x128xf32>
    %c0_6 = arith.constant 0 : index
    %c0_7 = arith.constant 0 : index
    %8 = vector.load %arg4[%c0_6, %c0_7] : memref<128x128xf32, #tpu.memory_space<vmem>>, vector<128x128xf32>
    %cst_8 = arith.constant dense<0.000000e+00> : vector<8x128xf32>
    %9 = tpu.matmul %7, %8, %cst_8 {dimension_numbers = #tpu.dot_dimension_numbers<[1], [0], [0], [1], [0, 0, 1, 1], [], []>} : vector<8x128xf32>, vector<128x128xf32>, vector<8x128xf32> -> vector<8x128xf32>
    %c0_9 = arith.constant 0 : index
    %c0_10 = arith.constant 0 : index
    %10 = vector.load %arg5[%c0_9, %c0_10] : memref<1x128xf32, #tpu.memory_space<vmem>>, vector<1x128xf32>
    %11 = vector.broadcast %10 : vector<1x128xf32> to vector<8x128xf32>
    %12 = arith.addf %9, %11 : vector<8x128xf32>
    %cst_11 = arith.constant 0.000000e+00 : f32
    %13 = vector.broadcast %cst_11 : f32 to vector<8x128xf32>
    %14 = arith.maximumf %12, %13 : vector<8x128xf32>
    %c0_12 = arith.constant 0 : index
    %c0_13 = arith.constant 0 : index
    %15 = vector.load %arg6[%c0_12, %c0_13] : memref<128x128xf32, #tpu.memory_space<vmem>>, vector<128x128xf32>
    %cst_14 = arith.constant dense<0.000000e+00> : vector<8x128xf32>
    %16 = tpu.matmul %14, %15, %cst_14 {dimension_numbers = #tpu.dot_dimension_numbers<[1], [0], [0], [1], [0, 0, 1, 1], [], []>} : vector<8x128xf32>, vector<128x128xf32>, vector<8x128xf32> -> vector<8x128xf32>
    %c0_15 = arith.constant 0 : index
    %c0_16 = arith.constant 0 : index
    %17 = vector.load %arg7[%c0_15, %c0_16] : memref<1x128xf32, #tpu.memory_space<vmem>>, vector<1x128xf32>
    %18 = vector.broadcast %17 : vector<1x128xf32> to vector<8x128xf32>
    %19 = arith.addf %16, %18 : vector<8x128xf32>
    %cst_17 = arith.constant dense<0xFF800000> : vector<8xf32>
    %20 = vector.multi_reduction <maximumf>, %19, %cst_17 [1] : vector<8x128xf32> to vector<8xf32>
    %21 = vector.shape_cast %20 : vector<8xf32> to vector<8x1xf32>
    %22 = vector.broadcast %21 : vector<8x1xf32> to vector<8x128xf32>
    %23 = arith.subf %19, %22 : vector<8x128xf32>
    %24 = math.exp %23 : vector<8x128xf32>
    %cst_18 = arith.constant dense<0.000000e+00> : vector<8xf32>
    %25 = vector.multi_reduction <add>, %24, %cst_18 [1] : vector<8x128xf32> to vector<8xf32>
    %26 = vector.shape_cast %25 : vector<8xf32> to vector<8x1xf32>
    %27 = math.log %26 : vector<8x1xf32>
    %28 = vector.broadcast %27 : vector<8x1xf32> to vector<8x128xf32>
    %29 = arith.subf %23, %28 : vector<8x128xf32>
    %c0_19 = arith.constant 0 : index
    %c0_20 = arith.constant 0 : index
    %30 = vector.load %arg8[%c0_19, %c0_20] : memref<8x128xf32, #tpu.memory_space<vmem>>, vector<8x128xf32>
    tpu.vector_store %arg8[%c0_19, %c0_20], %29 {strides = array<i32>} : memref<8x128xf32, #tpu.memory_space<vmem>>, vector<8x128xf32>,
    return
  }
  func.func @transform_0(%arg0: i32) -> (i32, i32) {
    %c0_i32 = arith.constant 0 : i32
    %c0_i32_0 = arith.constant 0 : i32
    return %arg0, %c0_i32 : i32, i32
  }
  func.func @transform_1(%arg0: i32) -> (i32, i32) {
    %c0_i32 = arith.constant 0 : i32
    %c0_i32_0 = arith.constant 0 : i32
    %c0_i32_1 = arith.constant 0 : i32
    return %c0_i32, %c0_i32_0 : i32, i32
  }
  func.func @transform_2(%arg0: i32) -> (i32, i32) {
    %c0_i32 = arith.constant 0 : i32
    %c0_i32_0 = arith.constant 0 : i32
    %c0_i32_1 = arith.constant 0 : i32
    return %c0_i32, %c0_i32_0 : i32, i32
  }
  func.func @transform_3(%arg0: i32) -> (i32, i32) {
    %c0_i32 = arith.constant 0 : i32
    %c0_i32_0 = arith.constant 0 : i32
    %c0_i32_1 = arith.constant 0 : i32
    return %c0_i32, %c0_i32_0 : i32, i32
  }
  func.func @transform_4(%arg0: i32) -> (i32, i32) {
    %c0_i32 = arith.constant 0 : i32
    %c0_i32_0 = arith.constant 0 : i32
    %c0_i32_1 = arith.constant 0 : i32
    return %c0_i32, %c0_i32_0 : i32, i32
  }
  func.func @transform_5(%arg0: i32) -> (i32, i32) {
    %c0_i32 = arith.constant 0 : i32
    %c0_i32_0 = arith.constant 0 : i32
    %c0_i32_1 = arith.constant 0 : i32
    return %c0_i32, %c0_i32_0 : i32, i32
  }
  func.func @transform_6(%arg0: i32) -> (i32, i32) {
    %c0_i32 = arith.constant 0 : i32
    %c0_i32_0 = arith.constant 0 : i32
    %c0_i32_1 = arith.constant 0 : i32
    return %c0_i32, %c0_i32_0 : i32, i32
  }
  func.func @transform_7(%arg0: i32) -> (i32, i32) {
    %c0_i32 = arith.constant 0 : i32
    %c0_i32_0 = arith.constant 0 : i32
    return %arg0, %c0_i32 : i32, i32
  }
}

</mosaic_0001>

<bundles_post_ra>
// kernel: mlp_forward.1
= control target key start
LH: loop header
LB: loop body
LE: loop exit
PB: predicated region body
PF: predicated region fallthrough
CT: control target
= control target key end

     0   :  { %vm138_vm0 = vcmask 130048   ;;  %vm855_vm1 = vmmov 0   ;;  %s1359_s1 = inlined_call_operand.vmem [shape: f32[784,128], index: 1, kind: input, shape index: {}]   ;;  %s1360_s0 = inlined_call_operand.vmem [shape: f32[8,784], index: 0, kind: input, shape index: {}]   ;;  %s1361_s3 = inlined_call_operand.vmem [shape: f32[128,128], index: 3, kind: input, shape index: {}]   ;;  %s1362_s5 = inlined_call_operand.vmem [shape: f32[128,128], index: 5, kind: input, shape index: {}]   ;;  %s1363_s2 = inlined_call_operand.vmem [shape: f32[1,128], index: 2, kind: input, shape index: {}]   ;;  %s1364_s4 = inlined_call_operand.vmem [shape: f32[1,128], index: 4, kind: input, shape index: {}]   ;;  %s1365_s6 = inlined_call_operand.vmem [shape: f32[1,128], index: 6, kind: input, shape index: {}]   ;;  %s1366_s7 = inlined_call_operand.vmem [shape: f32[8,128], index: 7, kind: output, shape index: {}]  }
   0x1   :  { %v64_v0 = vld [vmem:[%s1359_s1 + $0xf8] sm:$0xff]  ;;  %v63_v2 = vld [vmem:[%s1359_s1 + $0xf0] sm:$0xff]  ;;  %v62_v6 = vld [vmem:[%s1359_s1 + $0xe8] sm:$0xff] }
   0x2   :  { %v48_v1 = vld [vmem:[%s1359_s1 + $0x78] sm:$0xff]  ;;  %629 = vmatprep.subr.mxu0 %v64_v0  ;;  %v47_v4 = vld [vmem:[%s1359_s1 + $0x70] sm:$0xff]  ;;  %v46_v8 = vld [vmem:[%s1359_s1 + $0x68] sm:$0xff] }
   0x3   :  { %v96_v3 = vld [vmem:[%s1359_s1 + $0x1f8] sm:$0xff]  ;;  %630 = vmatpush3.msra.mxu0 %v48_v1  ;;  %v95_v7 = vld [vmem:[%s1359_s1 + $0x1f0] sm:$0xff]  ;;  %v94_v10 = vld [vmem:[%s1359_s1 + $0x1e8] sm:$0xff] }
   0x4   :  { %v80_v5 = vld [vmem:[%s1359_s1 + $0x178] sm:$0xff]  ;;  %664 = vmatprep.subr.mxu1 %v96_v3  ;;  %631 = vmatprep.subr.mxu0 %v63_v2  ;;  %v79_v9 = vld [vmem:[%s1359_s1 + $0x170] sm:$0xff]  ;;  %v61_v11 = vld [vmem:[%s1359_s1 + $0xe0] sm:$0xff] }
   0x5   :  { %665 = vmatpush3.msra.mxu1 %v80_v5  ;;  %632 = vmatpush3.msra.mxu0 %v47_v4  ;;  %v78_v12 = vld [vmem:[%s1359_s1 + $0x168] sm:$0xff]  ;;  %v45_v13 = vld [vmem:[%s1359_s1 + $0x60] sm:$0xff]  ;;  %v60_v15 = vld [vmem:[%s1359_s1 + $0xd8] sm:$0xff] }
   0x6   :  { %666 = vmatprep.subr.mxu1 %v95_v7  ;;  %633 = vmatprep.subr.mxu0 %v62_v6  ;;  %v93_v14 = vld [vmem:[%s1359_s1 + $0x1e0] sm:$0xff]  ;;  %v44_v17 = vld [vmem:[%s1359_s1 + $0x58] sm:$0xff]  ;;  %v59_v19 = vld [vmem:[%s1359_s1 + $0xd0] sm:$0xff] }
   0x7   :  { %667 = vmatpush3.msra.mxu1 %v79_v9  ;;  %634 = vmatpush3.msra.mxu0 %v46_v8  ;;  %v77_v16 = vld [vmem:[%s1359_s1 + $0x160] sm:$0xff]  ;;  %v92_v18 = vld [vmem:[%s1359_s1 + $0x1d8] sm:$0xff]  ;;  %v43_v21 = vld [vmem:[%s1359_s1 + $0x50] sm:$0xff] }
   0x8   :  { %668 = vmatprep.subr.mxu1 %v94_v10  ;;  %635 = vmatprep.subr.mxu0 %v61_v11  ;;  %v76_v20 = vld [vmem:[%s1359_s1 + $0x158] sm:$0xff]  ;;  %v91_v22 = vld [vmem:[%s1359_s1 + $0x1d0] sm:$0xff]  ;;  %v58_v23 = vld [vmem:[%s1359_s1 + $0xc8] sm:$0xff] }
   0x9   :  { %669 = vmatpush3.msra.mxu1 %v78_v12  ;;  %636 = vmatpush3.msra.mxu0 %v45_v13  ;;  %v75_v24 = vld [vmem:[%s1359_s1 + $0x150] sm:$0xff]  ;;  %v42_v25 = vld [vmem:[%s1359_s1 + $0x48] sm:$0xff]  ;;  %v57_v27 = vld [vmem:[%s1359_s1 + $0xc0] sm:$0xff] }
   0xa   :  { %670 = vmatprep.subr.mxu1 %v93_v14  ;;  %637 = vmatprep.subr.mxu0 %v60_v15  ;;  %v90_v26 = vld [vmem:[%s1359_s1 + $0x1c8] sm:$0xff]  ;;  %v41_v29 = vld [vmem:[%s1359_s1 + $0x40] sm:$0xff]  ;;  %v56_v31 = vld [vmem:[%s1359_s1 + $0xb8] sm:$0xff]  ;;  %v854_v14 = vmov 0.0  }
   0xb   :  { %671 = vmatpush3.msra.mxu1 %v77_v16  ;;  %638 = vmatpush3.msra.mxu0 %v44_v17  ;;  %v74_v28 = vld [vmem:[%s1359_s1 + $0x148] sm:$0xff]  ;;  %v89_v30 = vld [vmem:[%s1359_s1 + $0x1c0] sm:$0xff]  ;;  %v40_v33 = vld [vmem:[%s1359_s1 + $0x38] sm:$0xff] }
   0xc   :  { %672 = vmatprep.subr.mxu1 %v92_v18  ;;  %639 = vmatprep.subr.mxu0 %v59_v19  ;;  %v73_v32 = vld [vmem:[%s1359_s1 + $0x140] sm:$0xff]  ;;  %v88_v34 = vld [vmem:[%s1359_s1 + $0x1b8] sm:$0xff]  ;;  %v55_v35 = vld [vmem:[%s1359_s1 + $0xb0] sm:$0xff] }
   0xd   :  { %673 = vmatpush3.msra.mxu1 %v76_v20  ;;  %640 = vmatpush3.msra.mxu0 %v43_v21  ;;  %v72_v36 = vld [vmem:[%s1359_s1 + $0x138] sm:$0xff]  ;;  %v39_v37 = vld [vmem:[%s1359_s1 + $0x30] sm:$0xff]  ;;  %v54_v39 = vld [vmem:[%s1359_s1 + $0xa8] sm:$0xff] }
   0xe   :  { %674 = vmatprep.subr.mxu1 %v91_v22  ;;  %641 = vmatprep.subr.mxu0 %v58_v23  ;;  %v87_v38 = vld [vmem:[%s1359_s1 + $0x1b0] sm:$0xff]  ;;  %v38_v41 = vld [vmem:[%s1359_s1 + $0x28] sm:$0xff]  ;;  %v53_v43 = vld [vmem:[%s1359_s1 + $0xa0] sm:$0xff] }
   0xf   :  { %675 = vmatpush3.msra.mxu1 %v75_v24  ;;  %642 = vmatpush3.msra.mxu0 %v42_v25  ;;  %v71_v40 = vld [vmem:[%s1359_s1 + $0x130] sm:$0xff]  ;;  %v86_v42 = vld [vmem:[%s1359_s1 + $0x1a8] sm:$0xff]  ;;  %v37_v45 = vld [vmem:[%s1359_s1 + $0x20] sm:$0xff] }
  0x10   :  { %676 = vmatprep.subr.mxu1 %v90_v26  ;;  %643 = vmatprep.subr.mxu0 %v57_v27  ;;  %v70_v44 = vld [vmem:[%s1359_s1 + $0x128] sm:$0xff]  ;;  %v85_v46 = vld [vmem:[%s1359_s1 + $0x1a0] sm:$0xff]  ;;  %v52_v47 = vld [vmem:[%s1359_s1 + $0x98] sm:$0xff] }
  0x11   :  { %677 = vmatpush3.msra.mxu1 %v74_v28  ;;  %644 = vmatpush3.msra.mxu0 %v41_v29  ;;  %v69_v48 = vld [vmem:[%s1359_s1 + $0x120] sm:$0xff]  ;;  %v36_v49 = vld [vmem:[%s1359_s1 + $0x18] sm:$0xff]  ;;  %v51_v51 = vld [vmem:[%s1359_s1 + $0x90] sm:$0xff] }
  0x12   :  { %678 = vmatprep.subr.mxu1 %v89_v30  ;;  %645 = vmatprep.subr.mxu0 %v56_v31  ;;  %v84_v50 = vld [vmem:[%s1359_s1 + $0x198] sm:$0xff]  ;;  %v35_v53 = vld [vmem:[%s1359_s1 + $0x10] sm:$0xff]  ;;  %v50_v55 = vld [vmem:[%s1359_s1 + $0x88] sm:$0xff] }
  0x13   :  { %679 = vmatpush3.msra.mxu1 %v73_v32  ;;  %646 = vmatpush3.msra.mxu0 %v40_v33  ;;  %v68_v52 = vld [vmem:[%s1359_s1 + $0x118] sm:$0xff]  ;;  %v83_v54 = vld [vmem:[%s1359_s1 + $0x190] sm:$0xff]  ;;  %v34_v57 = vld [vmem:[%s1359_s1 + $0x8] sm:$0xff] }
  0x14   :  { %680 = vmatprep.subr.mxu1 %v88_v34  ;;  %647 = vmatprep.subr.mxu0 %v55_v35  ;;  %v67_v56 = vld [vmem:[%s1359_s1 + $0x110] sm:$0xff]  ;;  %v82_v58 = vld [vmem:[%s1359_s1 + $0x188] sm:$0xff]  ;;  %v49_v59 = vld [vmem:[%s1359_s1 + $0x80] sm:$0xff] }
  0x15   :  { %681 = vmatpush3.msra.mxu1 %v72_v36  ;;  %648 = vmatpush3.msra.mxu0 %v39_v37  ;;  %v27_v60 = vld [vmem:[%s1360_s0 + $0x8] sm:$0xff]  ;;  %v33_v61 = vld [vmem:[%s1359_s1] sm:$0xff]  ;;  %v128_v1 = vld [vmem:[%s1359_s1 + $0x2f8] sm:$0xff] }
  0x16   :  { %682 = vmatprep.subr.mxu1 %v87_v38  ;;  %649 = vmatprep.subr.mxu0 %v54_v39  ;;  %v66_v62 = vld [vmem:[%s1359_s1 + $0x108] sm:$0xff]  ;;  %v26_v63 = vld [vmem:[%s1360_s0] sm:$0xff]  ;;  %v29_v3 = vld [vmem:[%s1360_s0 + $0x18] sm:$0xff] }
  0x17   :  { %683 = vmatpush3.msra.mxu1 %v71_v40  ;;  %650 = vmatpush3.msra.mxu0 %v38_v41  ;;  %v81_v0 = vld [vmem:[%s1359_s1 + $0x180] sm:$0xff]  ;;  %v112_v4 = vld [vmem:[%s1359_s1 + $0x278] sm:$0xff]  ;;  %v28_v5 = vld [vmem:[%s1360_s0 + $0x10] sm:$0xff] }
  0x18   :  { %684 = vmatprep.subr.mxu1 %v86_v42  ;;  %651 = vmatprep.subr.mxu0 %v53_v43  ;;  %v65_v2 = vld [vmem:[%s1359_s1 + $0x100] sm:$0xff]  ;;  %v127_v6 = vld [vmem:[%s1359_s1 + $0x2f0] sm:$0xff]  ;;  %v31_v8 = vld [vmem:[%s1360_s0 + $0x28] sm:$0xff] }
  0x19   :  { %685 = vmatpush3.msra.mxu1 %v70_v44  ;;  %652 = vmatpush3.msra.mxu0 %v37_v45  ;;  %v111_v7 = vld [vmem:[%s1359_s1 + $0x270] sm:$0xff]  ;;  %v126_v9 = vld [vmem:[%s1359_s1 + $0x2e8] sm:$0xff]  ;;  %v125_v12 = vld [vmem:[%s1359_s1 + $0x2e0] sm:$0xff] }
  0x1a   :  { %686 = vmatprep.subr.mxu1 %v85_v46  ;;  %653 = vmatprep.subr.mxu0 %v52_v47  ;;  %v110_v10 = vld [vmem:[%s1359_s1 + $0x268] sm:$0xff]  ;;  %v109_v13 = vld [vmem:[%s1359_s1 + $0x260] sm:$0xff]  ;;  %v124_v16 = vld [vmem:[%s1359_s1 + $0x2d8] sm:$0xff] }
  0x1b   :  { %687 = vmatpush3.msra.mxu1 %v69_v48  ;;  %654 = vmatpush3.msra.mxu0 %v36_v49  ;;  %v130_v11 = vld [vmem:[%s1359_s1 + $0x308] sm:$0xff]  ;;  %v129_v15 = vld [vmem:[%s1359_s1 + $0x300] sm:$0xff]  ;;  %v108_v17 = vld [vmem:[%s1359_s1 + $0x258] sm:$0xff] }
  0x1c   :  { %688 = vmatprep.subr.mxu1 %v84_v50  ;;  %655 = vmatprep.subr.mxu0 %v51_v51  ;;  %v32_v18 = vld [vmem:[%s1360_s0 + $0x30] sm:$0xff]  ;;  %v122_v21 = vld [vmem:[%s1359_s1 + $0x2c8] sm:$0xff]  ;;  %v121_v23 = vld [vmem:[%s1359_s1 + $0x2c0] sm:$0xff] }
  0x1d   :  { %689 = vmatpush3.msra.mxu1 %v68_v52  ;;  %656 = vmatpush3.msra.mxu0 %v35_v53  ;;  %v123_v19 = vld [vmem:[%s1359_s1 + $0x2d0] sm:$0xff]  ;;  %v106_v22 = vld [vmem:[%s1359_s1 + $0x248] sm:$0xff]  ;;  %v105_v24 = vld [vmem:[%s1359_s1 + $0x240] sm:$0xff] }
  0x1e   :  { %690 = vmatprep.subr.mxu1 %v83_v54  ;;  %657 = vmatprep.subr.mxu0 %v50_v55  ;;  %v107_v20 = vld [vmem:[%s1359_s1 + $0x250] sm:$0xff]  ;;  %v120_v25 = vld [vmem:[%s1359_s1 + $0x2b8] sm:$0xff]  ;;  %v118_v29 = vld [vmem:[%s1359_s1 + $0x2a8] sm:$0xff] }
  0x1f   :  { %691 = vmatpush3.msra.mxu1 %v67_v56  ;;  %658 = vmatpush3.msra.mxu0 %v34_v57  ;;  %v104_v26 = vld [vmem:[%s1359_s1 + $0x238] sm:$0xff]  ;;  %v119_v27 = vld [vmem:[%s1359_s1 + $0x2b0] sm:$0xff]  ;;  %v102_v30 = vld [vmem:[%s1359_s1 + $0x228] sm:$0xff] }
  0x20   :  { %692 = vmatprep.subr.mxu1 %v82_v58  ;;  %659 = vmatprep.subr.mxu0 %v49_v59  ;;  %v103_v28 = vld [vmem:[%s1359_s1 + $0x230] sm:$0xff]  ;;  %v117_v31 = vld [vmem:[%s1359_s1 + $0x2a0] sm:$0xff]  ;;  %v116_v33 = vld [vmem:[%s1359_s1 + $0x298] sm:$0xff] }
  0x21   :  { %206 = vmatprep.mubr.f32.mxu0 %v27_v60  ;;  %660 = vmatpush3.msra.mxu0 %v33_v61  ;;  %v101_v32 = vld [vmem:[%s1359_s1 + $0x220] sm:$0xff]  ;;  %v100_v34 = vld [vmem:[%s1359_s1 + $0x218] sm:$0xff]  ;;  %v115_v35 = vld [vmem:[%s1359_s1 + $0x290] sm:$0xff] }
  0x22   :  { %693 = vmatpush3.msra.mxu1 %v66_v62  ;;  %207 = vmatmul.mubr.f32.vlgmr.msra.gmra.mxu0 %v26_v63  ;;  %v99_v36 = vld [vmem:[%s1359_s1 + $0x210] sm:$0xff]  ;;  %v114_v37 = vld [vmem:[%s1359_s1 + $0x288] sm:$0xff]  ;;  %v113_v39 = vld [vmem:[%s1359_s1 + $0x280] sm:$0xff] }
  0x23   :  { %694 = vmatprep.subr.mxu1 %v81_v0  ;;  %699 = vmatprep.subr.mxu0 %v128_v1  ;;  %v98_v38 = vld [vmem:[%s1359_s1 + $0x208] sm:$0xff]  ;;  %v97_v40 = vld [vmem:[%s1359_s1 + $0x200] sm:$0xff]  ;;  %v438_v42 = vld [vmem:[%s1361_s3 + $0x78] sm:$0xff] }
  0x24   :  { %695 = vmatpush3.msra.mxu1 %v65_v2  ;;  %276 = vmatprep.mubr.f32.mxu1 %v29_v3  ;;  %v30_v41 = vld [vmem:[%s1360_s0 + $0x20] sm:$0xff]  ;;  %v437_v43 = vld [vmem:[%s1361_s3 + $0x70] sm:$0xff]  ;;  %v436_v44 = vld [vmem:[%s1361_s3 + $0x68] sm:$0xff] }
  0x25   :  { %700 = vmatpush3.msra.mxu0 %v112_v4  ;;  %277 = vmatmul.mubr.f32.vlgmr.msra.gmra.mxu1 %v28_v5  ;;  %v435_v45 = vld [vmem:[%s1361_s3 + $0x60] sm:$0xff]  ;;  %v434_v46 = vld [vmem:[%s1361_s3 + $0x58] sm:$0xff]  ;;  %v433_v47 = vld [vmem:[%s1361_s3 + $0x50] sm:$0xff] }
  0x26   :  { %701 = vmatprep.subr.mxu0 %v127_v6  ;;  %346 = vmatprep.mubr.f32.mxu0 %v31_v8  ;;  %v432_v48 = vld [vmem:[%s1361_s3 + $0x48] sm:$0xff]  ;;  %v431_v49 = vld [vmem:[%s1361_s3 + $0x40] sm:$0xff]  ;;  %v430_v50 = vld [vmem:[%s1361_s3 + $0x38] sm:$0xff] }
  0x27   :  { %702 = vmatpush3.msra.mxu0 %v111_v7  ;;  %771 = vmatprep.subr.mxu1 %v854_v14  ;;  %v429_v51 = vld [vmem:[%s1361_s3 + $0x30] sm:$0xff]  ;;  %v428_v52 = vld [vmem:[%s1361_s3 + $0x28] sm:$0xff]  ;;  %v427_v53 = vld [vmem:[%s1361_s3 + $0x20] sm:$0xff] }
  0x28   :  { %703 = vmatprep.subr.mxu0 %v126_v9  ;;  %772 = vmatpush3.msra.mxu1 %v130_v11  ;;  %v426_v54 = vld [vmem:[%s1361_s3 + $0x18] sm:$0xff]  ;;  %v425_v55 = vld [vmem:[%s1361_s3 + $0x10] sm:$0xff]  ;;  %v424_v56 = vld [vmem:[%s1361_s3 + $0x8] sm:$0xff] }
  0x29   :  { %704 = vmatpush3.msra.mxu0 %v110_v10  ;;  %773 = vmatprep.subr.mxu1 %v854_v14  ;;  %v423_v57 = vld [vmem:[%s1361_s3] sm:$0xff]  ;;  %v532_v58 = vld [vmem:[%s1362_s5 + $0x78] sm:$0xff]  ;;  %v531_v59 = vld [vmem:[%s1362_s5 + $0x70] sm:$0xff] }
  0x2a   :  { %705 = vmatprep.subr.mxu0 %v125_v12  ;;  %774 = vmatpush3.msra.mxu1 %v129_v15  ;;  %v530_v60 = vld [vmem:[%s1362_s5 + $0x68] sm:$0xff]  ;;  %v529_v61 = vld [vmem:[%s1362_s5 + $0x60] sm:$0xff]  ;;  %v528_v62 = vld [vmem:[%s1362_s5 + $0x58] sm:$0xff] }
  0x2b   :  { %706 = vmatpush3.msra.mxu0 %v109_v13  ;;  %775 = vmatprep.mubr.msk.f32.mxu1 %vm855_vm1, %v854_v14  ;;  %v527_v63 = vld [vmem:[%s1362_s5 + $0x50] sm:$0xff]  ;;  %v526_v0 = vld [vmem:[%s1362_s5 + $0x48] sm:$0xff]  ;;  %v525_v1 = vld [vmem:[%s1362_s5 + $0x40] sm:$0xff] }
  0x2c   :  { %707 = vmatprep.subr.mxu0 %v124_v16  ;;  %776 = vmatmul.mubr.msk.f32.vlgmr.msra.gmra.mxu1 %vm138_vm0, %v32_v18  ;;  %v524_v2 = vld [vmem:[%s1362_s5 + $0x38] sm:$0xff]  ;;  %v523_v3 = vld [vmem:[%s1362_s5 + $0x30] sm:$0xff]  ;;  %v522_v4 = vld [vmem:[%s1362_s5 + $0x28] sm:$0xff] }
  0x2d   :  { %708 = vmatpush3.msra.mxu0 %v108_v17  ;;  %778 = vmatprep.subr.mxu1 %v854_v14  ;;  %v521_v5 = vld [vmem:[%s1362_s5 + $0x20] sm:$0xff]  ;;  %v520_v6 = vld [vmem:[%s1362_s5 + $0x18] sm:$0xff] }
  0x2e   :  { %709 = vmatprep.subr.mxu0 %v123_v19  ;;  %810 = vmatprep.mubr.msk.f32.mxu1 %vm855_vm1, %v854_v14  ;;  %v625_v15 = vld [vmem:[%s1363_s2] ss:$0 sm:$0xff] }
  0x2f   :  { %710 = vmatpush3.msra.mxu0 %v107_v20  ;;  %779 = vmatpush3.msra.mxu1 %v438_v42 }
  0x30   :  { %711 = vmatprep.subr.mxu0 %v122_v21  ;;  %780 = vmatprep.subr.mxu1 %v854_v14 }
  0x31   :  { %712 = vmatpush3.msra.mxu0 %v106_v22  ;;  %781 = vmatpush3.msra.mxu1 %v437_v43 }
  0x32   :  { %713 = vmatprep.subr.mxu0 %v121_v23  ;;  %782 = vmatprep.subr.mxu1 %v854_v14 }
  0x33   :  { %714 = vmatpush3.msra.mxu0 %v105_v24  ;;  %783 = vmatpush3.msra.mxu1 %v436_v44 }
  0x34   :  { %715 = vmatprep.subr.mxu0 %v120_v25  ;;  %784 = vmatprep.subr.mxu1 %v854_v14  ;;  %v519_v25 = vld [vmem:[%s1362_s5 + $0x10] sm:$0xff] }
  0x35   :  { %716 = vmatpush3.msra.mxu0 %v104_v26  ;;  %785 = vmatpush3.msra.mxu1 %v435_v45  ;;  %v518_v26 = vld [vmem:[%s1362_s5 + $0x8] sm:$0xff] }
  0x36   :  { %717 = vmatprep.subr.mxu0 %v119_v27  ;;  %786 = vmatprep.subr.mxu1 %v854_v14  ;;  %v517_v27 = vld [vmem:[%s1362_s5] sm:$0xff] }
  0x37   :  { %718 = vmatpush3.msra.mxu0 %v103_v28  ;;  %787 = vmatpush3.msra.mxu1 %v434_v46  ;;  %v627_v28 = vld [vmem:[%s1364_s4] ss:$0 sm:$0xff] }
  0x38   :  { %719 = vmatprep.subr.mxu0 %v118_v29  ;;  %788 = vmatprep.subr.mxu1 %v854_v14 }
  0x39   :  { %720 = vmatpush3.msra.mxu0 %v102_v30  ;;  %789 = vmatpush3.msra.mxu1 %v433_v47 }
  0x3a   :  { %721 = vmatprep.subr.mxu0 %v117_v31  ;;  %790 = vmatprep.subr.mxu1 %v854_v14 }
  0x3b   :  { %722 = vmatpush3.msra.mxu0 %v101_v32  ;;  %791 = vmatpush3.msra.mxu1 %v432_v48 }
  0x3c   :  { %723 = vmatprep.subr.mxu0 %v116_v33  ;;  %792 = vmatprep.subr.mxu1 %v854_v14  ;;  %v628_v33 = vld [vmem:[%s1365_s6] ss:$0 sm:$0xff] }
  0x3d   :  { %724 = vmatpush3.msra.mxu0 %v100_v34  ;;  %793 = vmatpush3.msra.mxu1 %v431_v49 }
  0x3e   :  { %725 = vmatprep.subr.mxu0 %v115_v35  ;;  %794 = vmatprep.subr.mxu1 %v854_v14 }
  0x3f   :  { %726 = vmatpush3.msra.mxu0 %v99_v36  ;;  %795 = vmatpush3.msra.mxu1 %v430_v50 }
  0x40   :  { %727 = vmatprep.subr.mxu0 %v114_v37  ;;  %796 = vmatprep.subr.mxu1 %v854_v14 }
  0x41   :  { %728 = vmatpush3.msra.mxu0 %v98_v38  ;;  %797 = vmatpush3.msra.mxu1 %v429_v51 }
  0x42   :  { %729 = vmatprep.subr.mxu0 %v113_v39  ;;  %798 = vmatprep.subr.mxu1 %v854_v14 }
  0x43   :  { %730 = vmatpush3.msra.mxu0 %v97_v40  ;;  %799 = vmatpush3.msra.mxu1 %v428_v52 }
  0x44   :  { %347 = vmatmul.mubr.f32.vlgmr.msra.gmra.mxu0 %v30_v41  ;;  %813 = vmatprep.subr.mxu0 %v854_v14 }
  0x45   :  { %845 = vmatprep.mubr.msk.f32.mxu0 %vm855_vm1, %v854_v14  ;;  %800 = vmatprep.subr.mxu1 %v854_v14 }
  0x46   :  { %801 = vmatpush3.msra.mxu1 %v427_v53  ;;  %814 = vmatpush3.msra.mxu0 %v532_v58 }
  0x47   :  { %802 = vmatprep.subr.mxu1 %v854_v14  ;;  %815 = vmatprep.subr.mxu0 %v854_v14 }
  0x48   :  { %803 = vmatpush3.msra.mxu1 %v426_v54  ;;  %816 = vmatpush3.msra.mxu0 %v531_v59 }
  0x49   :  { %804 = vmatprep.subr.mxu1 %v854_v14  ;;  %817 = vmatprep.subr.mxu0 %v854_v14 }
  0x4a   :  { %805 = vmatpush3.msra.mxu1 %v425_v55  ;;  %818 = vmatpush3.msra.mxu0 %v530_v60 }
  0x4b   :  { %806 = vmatprep.subr.mxu1 %v854_v14  ;;  %819 = vmatprep.subr.mxu0 %v854_v14 }
  0x4c   :  { %807 = vmatpush3.msra.mxu1 %v424_v56  ;;  %820 = vmatpush3.msra.mxu0 %v529_v61 }
  0x4d   :  { %808 = vmatprep.subr.mxu1 %v854_v14  ;;  %821 = vmatprep.subr.mxu0 %v854_v14 }
  0x4e   :  { %809 = vmatpush3.msra.mxu1 %v423_v57  ;;  %822 = vmatpush3.msra.mxu0 %v528_v62 }
  0x4f   :  { %823 = vmatprep.subr.mxu0 %v854_v14 }
  0x50   :  { %824 = vmatpush3.msra.mxu0 %v527_v63 }
  0x51   :  { %825 = vmatprep.subr.mxu0 %v854_v14 }
  0x52   :  { %826 = vmatpush3.msra.mxu0 %v526_v0 }
  0x53   :  { %827 = vmatprep.subr.mxu0 %v854_v14 }
  0x54   :  { %828 = vmatpush3.msra.mxu0 %v525_v1 }
  0x55   :  { %829 = vmatprep.subr.mxu0 %v854_v14 }
  0x56   :  { %830 = vmatpush3.msra.mxu0 %v524_v2 }
  0x57   :  { %831 = vmatprep.subr.mxu0 %v854_v14 }
  0x58   :  { %832 = vmatpush3.msra.mxu0 %v523_v3 }
  0x59   :  { %833 = vmatprep.subr.mxu0 %v854_v14 }
  0x5a   :  { %834 = vmatpush3.msra.mxu0 %v522_v4 }
  0x5b   :  { %835 = vmatprep.subr.mxu0 %v854_v14 }
  0x5c   :  { %836 = vmatpush3.msra.mxu0 %v521_v5 }
  0x5d   :  { %837 = vmatprep.subr.mxu0 %v854_v14 }
  0x5e   :  { %838 = vmatpush3.msra.mxu0 %v520_v6 }
  0x5f   :  { %839 = vmatprep.subr.mxu0 %v854_v14 }
  0x60   :  { %840 = vmatpush3.msra.mxu0 %v519_v25 }
  0x61   :  { %841 = vmatprep.subr.mxu0 %v854_v14 }
  0x62   :  { %842 = vmatpush3.msra.mxu0 %v518_v26 }
  0x63   :  { %843 = vmatprep.subr.mxu0 %v854_v14 }
  0x64   :  { %844 = vmatpush3.msra.mxu0 %v517_v27 }
  0xe2   :  { %v661_v11 = vpop.f32.mrf.mxu0 }
  0xe4   :  { %v662_v12 = vpop.f32.mrf.mxu0 }
  0xe5   :  { %v696_v7 = vpop.f32.mrf.mxu1  ;;  %v663_v13 = vadd.f32 %v662_v12, %v661_v11 }
  0xe7   :  { %v697_v8 = vpop.f32.mrf.mxu1  ;;  %v209_v16 = vadd.f32 %v663_v13, %v625_v15 }
  0xe8   :  { %v698_v17 = vadd.f32 %v697_v8, %v696_v7 }
  0xea   :  { %v279_v20 = vadd.f32 %v698_v17, %v209_v16 }
  0xec   :  { %v418_v9 = vpop.f32.mrf.mxu1 }
  0xee   :  { %v777_v10 = vpop.f32.mrf.mxu1 }
 0x104   :  { %v731_v18 = vpop.f32.mrf.mxu0 }
 0x106   :  { %v732_v19 = vpop.f32.mrf.mxu0 }
 0x107   :  { %v733_v21 = vadd.f32 %v732_v19, %v731_v18 }
 0x109   :  { %v349_v22 = vadd.f32 %v733_v21, %v279_v20 }
 0x10b   :  { %v419_v23 = vadd.f32 %v418_v9, %v349_v22 }
 0x10d   :  { %v422_v24 = vmax.f32 %v419_v23, 0.0 }
 0x10f   :  { %811 = vmatmul.mubr.f32.vlgmr.msra.gmra.mxu1 %v422_v24 }
 0x1cf   :  { %v512_v29 = vpop.f32.mrf.mxu1 }
 0x1d0   :  { %v513_v30 = vadd.f32 %v627_v28, %v512_v29 }
 0x1d1   :  { %v812_v31 = vpop.f32.mrf.mxu1 }
 0x1d2   :  { %v516_v32 = vmax.f32 %v513_v30, 0.0 }
 0x1d4   :  { %846 = vmatmul.mubr.f32.vlgmr.msra.gmra.mxu0 %v516_v32 }
 0x294   :  { %v606_v34 = vpop.f32.mrf.mxu0 }
 0x295   :  { %v607_v14 = vadd.f32 %v628_v33, %v606_v34 }
 0x296   :  { %v847_v35 = vpop.f32.mrf.mxu0 }
 0x297   :  { %610 = vmax.xlane.f32.xlu0 %v607_v14 }
 0x320   :  { %v611_v36 = vpop.xlane.xlu0 %610 }
 0x321   :  { %v612_v37 = vsub.f32 %v607_v14, %v611_v36 }
 0x323   :  { %v613_v38 = vmul.f32 1.442695, %v612_v37 }
 0x325   :  { %850 = vpow2.f32 %v613_v38 }
 0x332   :  { %v851_v39 = vpop.eup %850 }
 0x333   :  { %615 = vadd.xlane.f32.xlu0 %v851_v39 }
 0x3bc   :  { %v616_v40 = vpop.xlane.xlu0 %615 }
 0x3bd   :  { %852 = vlog2.f32 %v616_v40 }
 0x3ca   :  { %v853_v41 = vpop.eup %852 }
 0x3cb   :  { %v618_v42 = vmul.f32 0.6931472, %v853_v41 }
 0x3cd   :  { %v619_v43 = vsub.f32 %v612_v37, %v618_v42 }
 0x3cf   :  { %620 = vst [vmem:[%s1366_s7] sm:$0xff] %v619_v43 }

</bundles_post_ra>
